<compile_context>
chip_gen: v7x
topology: tpu7x:2x2x1
jax: 0.10.0
libtpu: 0.0.40
codegen_flags: <defaults>
</compile_context>

<pallas_src>
import math
from functools import partial

import jax
import jax.numpy as jnp
from jax.experimental import pallas as pl
from jax.experimental.pallas import tpu as pltpu


# ------------------------------- kernel ---------------------------------------

def rmsnorm_kernel(x_ref, scale_ref, o_ref, *, eps):
    # x_ref: (block_rows, D) in the input dtype; scale_ref: (1, D) f32.
    x = x_ref[...].astype(jnp.float32)                          # .float()
    ms = jnp.mean(x * x, axis=-1, keepdims=True)                # mean(x^2, -1)
    y = (x * jax.lax.rsqrt(ms + eps)).astype(x_ref.dtype)       # .to(x.dtype)
    o_ref[...] = (scale_ref[...] * y).astype(o_ref.dtype)       # scale * x


# ------------------------------ wrapper ----------------------------------------

def rmsnorm(x, scale, eps=1e-6, block_rows=1024):
    """Pallas RMSNorm over the last dim of x. scale has shape (D,)."""
    *lead, D = x.shape
    rows = math.prod(lead) if lead else 1
    x2 = x.reshape(rows, D)
    scale2 = scale.reshape(1, D).astype(jnp.float32)
    out_dtype = jnp.promote_types(x.dtype, scale.dtype)         # torch: scale * x

    # VMEM budget for the pipelined buffers: in + out tiles, each double
    # buffered, kept under ~16 MiB total (leaves plenty of scoped-VMEM
    # headroom on every generation, including v7x's smaller VMEM).
    per_row_bytes = D * (x2.dtype.itemsize + jnp.dtype(out_dtype).itemsize) * 2
    cap = max(8, (16 * 1024 * 1024 // per_row_bytes) // 8 * 8)

    if rows >= 8:
        br = min(block_rows, cap, rows // 8 * 8)                 # multiple of 8
    else:
        br = rows                                                # full-extent block is always legal

    grid = (pl.cdiv(rows, br),)
    out = pl.pallas_call(
        partial(rmsnorm_kernel, eps=eps),
        out_shape=jax.ShapeDtypeStruct((rows, D), out_dtype),
        grid=grid,
        in_specs=[
            pl.BlockSpec((br, D), lambda i: (i, 0)),             # x rows tile
            pl.BlockSpec((1, D), lambda i: (0, 0)),              # scale (resident)
        ],
        out_specs=pl.BlockSpec((br, D), lambda i: (i, 0)),
        compiler_params=pltpu.CompilerParams(
            dimension_semantics=("parallel",)),
    )(x2, scale2)
    return out.reshape(*lead, D) if lead else out.reshape(D)


# ------------------------------ reference ---------------------------------------

def rmsnorm_ref(x, scale, eps=1e-6):
    xf = x.astype(jnp.float32)
    n = xf * jax.lax.rsqrt(jnp.mean(xf * xf, axis=-1, keepdims=True) + eps)
    return scale * n.astype(x.dtype)


# -------------------------------- main ------------------------------------------

if __name__ == "__main__":
    B, S, D = 2, 8, 256                      # lane-dense D (multiple of 128)
    key = jax.random.PRNGKey(0)
    kx, ks, kb = jax.random.split(key, 3)
    x = jax.random.normal(kx, (B, S, D), jnp.float32)
    scale = 1.0 + 0.05 * jax.random.normal(ks, (D,), jnp.float32)

    fwd = jax.jit(rmsnorm)
    y = fwd(x, scale)
    jax.block_until_ready(y)
    assert y.shape == (B, S, D) and y.dtype == jnp.float32, (y.shape, y.dtype)
    assert bool(jnp.all(jnp.isfinite(y)))
    assert bool(jnp.allclose(y, rmsnorm_ref(x, scale), atol=1e-5, rtol=1e-5))

    # Mixed-precision path: bf16 activations -> f32 math -> cast back -> f32 scale,
    # mirroring the reference .float()/.to(x.dtype) round-trip (torch promotes to f32).
    xb = jax.random.normal(kb, (B, S, D), jnp.float32).astype(jnp.bfloat16)
    yb = jax.jit(rmsnorm)(xb, scale)
    jax.block_until_ready(yb)
    assert yb.dtype == jnp.float32
    assert bool(jnp.allclose(yb, rmsnorm_ref(xb, scale), atol=2e-2, rtol=2e-2))

    # Ragged row count (rows not a multiple of the block) exercises the
    # partial-last-block path.
    xr = jax.random.normal(kx, (3, 5, D), jnp.float32)
    yr = jax.jit(rmsnorm)(xr, scale)
    jax.block_until_ready(yr)
    assert bool(jnp.allclose(yr, rmsnorm_ref(xr, scale), atol=1e-5, rtol=1e-5))

    print("KERNEL_OK")
</pallas_src>

<mosaic_0001>
module attributes {stable_mosaic.version = 11 : i64} {
  func.func @rmsnorm_kernel(%arg0: i32, %arg1: memref<16x256xf32, #tpu.memory_space<vmem>>, %arg2: memref<1x256xf32, #tpu.memory_space<vmem>>, %arg3: memref<16x256xf32, #tpu.memory_space<vmem>>) attributes {dimension_semantics = [#tpu.dimension_semantics<parallel>], iteration_bounds = array<i64: 1>, scalar_prefetch = 0 : i64, scratch_operands = 0 : i64, tpu.core_type = #tpu.core_type<tc>, window_params = [{transform_indices = @transform_0, window_bounds = array<i64: 16, 256>}, {pipeline_mode = #tpu.pipeline_mode<synchronous>, transform_indices = @transform_1, window_bounds = array<i64: 1, 256>}, {transform_indices = @transform_2, window_bounds = array<i64: 16, 256>}]} {
    %c0 = arith.constant 0 : index
    %c0_0 = arith.constant 0 : index
    %0 = vector.load %arg1[%c0, %c0_0] : memref<16x256xf32, #tpu.memory_space<vmem>>, vector<16x256xf32>
    %1 = arith.mulf %0, %0 : vector<16x256xf32>
    %cst = arith.constant dense<0.000000e+00> : vector<16xf32>
    %2 = vector.multi_reduction <add>, %1, %cst [1] : vector<16x256xf32> to vector<16xf32>
    %3 = vector.shape_cast %2 : vector<16xf32> to vector<16x1xf32>
    %cst_1 = arith.constant 2.560000e+02 : f32
    %4 = vector.broadcast %cst_1 : f32 to vector<16x1xf32>
    %5 = arith.divf %3, %4 : vector<16x1xf32>
    %cst_2 = arith.constant 9.99999997E-7 : f32
    %6 = vector.broadcast %cst_2 : f32 to vector<16x1xf32>
    %7 = arith.addf %5, %6 : vector<16x1xf32>
    %8 = math.rsqrt %7 : vector<16x1xf32>
    %9 = vector.broadcast %8 : vector<16x1xf32> to vector<16x256xf32>
    %10 = arith.mulf %0, %9 : vector<16x256xf32>
    %c0_3 = arith.constant 0 : index
    %c0_4 = arith.constant 0 : index
    %11 = vector.load %arg2[%c0_3, %c0_4] : memref<1x256xf32, #tpu.memory_space<vmem>>, vector<1x256xf32>
    %12 = vector.broadcast %11 : vector<1x256xf32> to vector<16x256xf32>
    %13 = arith.mulf %12, %10 : vector<16x256xf32>
    %c0_5 = arith.constant 0 : index
    %c0_6 = arith.constant 0 : index
    %14 = vector.load %arg3[%c0_5, %c0_6] : memref<16x256xf32, #tpu.memory_space<vmem>>, vector<16x256xf32>
    tpu.vector_store %arg3[%c0_5, %c0_6], %13 {strides = array<i32>} : memref<16x256xf32, #tpu.memory_space<vmem>>, vector<16x256xf32>,
    return
  }
  func.func @transform_0(%arg0: i32) -> (i32, i32) {
    %c0_i32 = arith.constant 0 : i32
    %c0_i32_0 = arith.constant 0 : i32
    return %arg0, %c0_i32 : i32, i32
  }
  func.func @transform_1(%arg0: i32) -> (i32, i32) {
    %c0_i32 = arith.constant 0 : i32
    %c0_i32_0 = arith.constant 0 : i32
    %c0_i32_1 = arith.constant 0 : i32
    return %c0_i32, %c0_i32_0 : i32, i32
  }
  func.func @transform_2(%arg0: i32) -> (i32, i32) {
    %c0_i32 = arith.constant 0 : i32
    %c0_i32_0 = arith.constant 0 : i32
    return %arg0, %c0_i32 : i32, i32
  }
}

</mosaic_0001>

<bundles_post_ra>
// kernel: rmsnorm.1
= control target key start
LH: loop header
LB: loop body
LE: loop exit
PB: predicated region body
PF: predicated region fallthrough
CT: control target
= control target key end

     0   :  { %7 = vsyncpa [#allocation3], 0  ;;  %s196_s0 = inlined_call_operand.hbm [shape: f32[16,256], index: 0, kind: input, shape index: {}]   ;;  %s197_s1 = inlined_call_operand.vmem [shape: f32[1,256], index: 1, kind: input, shape index: {}]   ;;  %s198_s2 = inlined_call_operand.hbm [shape: f32[16,256], index: 2, kind: output, shape index: {}]  }
   0x1   :  { %8 = vsyncpa [#allocation4], 0  ;;  %s144_s9 = smov [#allocation2]   ;;  %s96_s13 = scalar_lea.hbm %s196_s0, 512 }
   0x2   :  { %s14_s10 = sshll.u32 %s144_s9, 4  ;;  %p97_p0 = scmp.ne.s32.totalorder %s196_s0, %s96_s13  ;;  %s15_s10 = int_to_ptr.vmem [resolvable:$true] %s14_s10 }
   0x3   :  { %p100_p1 = scmp.lt.u32.totalorder %s96_s13, %s196_s0 }
   0x5   :  { %p102_p2 = pnand %p100_p1, %p97_p0 }
   0x7   :  { %105 = shalt.err (!%p102_p2)
}
   0x8   :  { %s106_s18 = scalar_lea.vmem %s15_s10, 512  ;;  %p111_p4 = scmp.lt.s32.totalorder %s15_s10, %s15_s10 }
   0x9   :  { %p107_p3 = scmp.ne.s32.totalorder %s15_s10, %s106_s18  ;;  %p112_p5 = scmp.lt.s32.totalorder %s106_s18, %s106_s18 }
   0xb   :  { %p113_p6 = por %p112_p5, %p111_p4 }
   0xd   :  { %p114_p7 = pnand %p113_p6, %p107_p3 }
   0xf   :  { %117 = shalt.err (!%p114_p7)
}
  0x10   :  { %s145_s19 = smov 256   ;;  %s146_s20 = smov 16  }
  0x11   :  { %20 = dma.hbm_to_vmem [thread:$0]  %s196_s0, 512, %s15_s10, [#allocation3], %s145_s19, %s145_s19, %s146_s20  }
  0x12   :  { %140 = dma.done.wait [#allocation3], 512  }
  0x13   :  { %141 = vsyncadd [#allocation3], 4294966784  ;;  %v26_v0 = vld [vmem:[#allocation2] sm:$0xff]  ;;  %v27_v1 = vld [vmem:[#allocation2 + $0x8] sm:$0xff]  ;;  %v53_v12 = vlaneseq  ;;  %s147_s24 = smov [#allocation5]  }
  0x14   :  { %v28_v2 = vld [vmem:[#allocation2 + $0x10] sm:$0xff]  ;;  %v30_v3 = vmul.f32 %v26_v0, %v26_v0  ;;  %v31_v4 = vmul.f32 %v27_v1, %v27_v1  ;;  %v29_v5 = vld [vmem:[#allocation2 + $0x18] sm:$0xff]  ;;  %v51_v20 = vld [vmem:[%s197_s1] sm:$0x3]  ;;  %s76_s25 = sshll.u32 %s147_s24, 4  ;;  %s77_s25 = int_to_ptr.vmem [resolvable:$true] %s76_s25 }
  0x15   :  { %v32_v6 = vmul.f32 %v28_v2, %v28_v2  ;;  %v33_v7 = vmul.f32 %v29_v5, %v29_v5  ;;  %v54_v16 = vshrl.u32 %v53_v12, 7  ;;  %s118_s1 = scalar_lea.vmem %s77_s25, 512  ;;  %p123_p9 = scmp.lt.s32.totalorder %s77_s25, %s77_s25 }
  0x16   :  { %v34_v8 = vadd.f32 %v31_v4, %v30_v3  ;;  %p119_p8 = scmp.ne.s32.totalorder %s77_s25, %s118_s1  ;;  %p124_p10 = scmp.lt.s32.totalorder %s118_s1, %s118_s1 }
  0x17   :  { %v37_v9 = vadd.f32 %v33_v7, %v32_v6  ;;  %v55_v18 = vsub.s32 0, %v54_v16  ;;  %v59_v19 = vsub.s32 1, %v54_v16 }
  0x18   :  { %35 = vadd.xlane.f32.xlu0 %v34_v8  ;;  %p125_p11 = por %p124_p10, %p123_p9 }
  0x19   :  { %v56_v21 = vrot.slane %v51_v20, %v55_v18  ;;  %v60_v22 = vrot.slane %v51_v20, %v59_v19 }
  0x1a   :  { %p126_p12 = pnand %p125_p11, %p119_p8 }
  0x1c   :  { %38 = vadd.xlane.f32.xlu0 %v37_v9 }
  0xa5   :  { %v36_v10 = vpop.xlane.xlu0 %35 }
  0xa6   :  { %v41_v11 = vmul.f32 0.00390625, %v36_v10 }
  0xa8   :  { %v43_v13 = vadd.f32 1e-06, %v41_v11 }
  0xa9   :  { %v39_v14 = vpop.xlane.xlu0 %38 }
  0xaa   :  { %92 = vrsqrt.f32 %v43_v13  ;;  %v42_v15 = vmul.f32 0.00390625, %v39_v14 }
  0xac   :  { %v44_v17 = vadd.f32 1e-06, %v42_v15 }
  0xae   :  { %94 = vrsqrt.f32 %v44_v17 }
  0xb4   :  { %v93_v23 = vpop.eup %92 }
  0xb5   :  { %v47_v24 = vmul.f32 %v93_v23, %v26_v0  ;;  %v48_v25 = vmul.f32 %v93_v23, %v27_v1 }
  0xb7   :  { %v63_v26 = vmul.f32 %v56_v21, %v47_v24  ;;  %v64_v27 = vmul.f32 %v60_v22, %v48_v25 }
  0xb8   :  { %v95_v28 = vpop.eup %94 }
  0xb9   :  { %v49_v29 = vmul.f32 %v95_v28, %v28_v2  ;;  %v50_v30 = vmul.f32 %v95_v28, %v29_v5  ;;  %67 = vst [vmem:[#allocation5] sm:$0xff] %v63_v26  ;;  %68 = vst [vmem:[#allocation5 + $0x8] sm:$0xff] %v64_v27 }
  0xbb   :  { %v65_v31 = vmul.f32 %v56_v21, %v49_v29  ;;  %v66_v32 = vmul.f32 %v60_v22, %v50_v30 }
  0xbd   :  { %69 = vst [vmem:[#allocation5 + $0x10] sm:$0xff] %v65_v31  ;;  %70 = vst [vmem:[#allocation5 + $0x18] sm:$0xff] %v66_v32 }
  0xbe   :  { %129 = shalt.err (!%p126_p12)
}
  0xbf   :  { %s130_s28 = scalar_lea.hbm %s198_s2, 512 }
  0xc0   :  { %p131_p13 = scmp.ne.s32.totalorder %s198_s2, %s130_s28  ;;  %p134_p0 = scmp.lt.u32.totalorder %s130_s28, %s198_s2 }
  0xc2   :  { %p136_p1 = pnand %p134_p0, %p131_p13 }
  0xc4   :  { %139 = shalt.err (!%p136_p1)
}
  0xc5   :  { %82 = dma.vmem_to_hbm [thread:$0]  %s77_s25, 512, %s198_s2, [#allocation4], %s145_s19, %s145_s19, %s146_s20  }
  0xc6   :  { %142 = dma.done.wait [#allocation4], 512  }
  0xc7   :  { %143 = vsyncadd [#allocation4], 4294966784 }
  0xc8   :  { %86 = vsyncpa [#allocation3], 1 }
  0xc9   :  { %87 = vsyncpa [#allocation4], 1 }

</bundles_post_ra>
